<compile_context>
chip_gen: v5e
topology: v5e:2x2
jax: 0.10.0
libtpu: 0.0.40
codegen_flags: <defaults>
</compile_context>

<pallas_src>
import functools

import jax
import jax.numpy as jnp
from jax.experimental import pallas as pl
from jax.experimental.pallas import tpu as pltpu

INPUT_DIM = 35
OUTPUT_DIM = 35
H1, H2, H3 = 50, 50, 30
FEAT = 128                      # lane-dense padded width for hidden/output layers
DEFAULT_TB = 4096               # batch tile (multiple of 16)
VMEM_LIMIT = 48 * 1024 * 1024   # > v5e 16 MiB / v6e 32 MiB defaults, < v7x 64 MiB physical


def _round_up(n, m):
    return ((n + m - 1) // m) * m


def _mlp_kernel(x_ref, w1_ref, b1_ref, w2_ref, b2_ref,
                w3_ref, b3_ref, w4_ref, b4_ref, o_ref):
    # x_ref: (TB, 35) f32 (unpadded); w1: (35, 128) bf16; w2..w4: (128, 128) bf16;
    # b*: (1, 128) f32; o_ref: (TB, 128) bf16.
    # Four MXU matmuls with bf16 operands and f32 accumulation; elementwise
    # epilogue (bias add / ReLU / tanh) in f32, final store in bf16.
    x = x_ref[...].astype(jnp.bfloat16)
    a = jnp.dot(x, w1_ref[...], preferred_element_type=jnp.float32) + b1_ref[...]
    a = jnp.maximum(a, 0.0)
    a = jnp.dot(a.astype(jnp.bfloat16), w2_ref[...],
                preferred_element_type=jnp.float32) + b2_ref[...]
    a = jnp.maximum(a, 0.0)
    a = jnp.dot(a.astype(jnp.bfloat16), w3_ref[...],
                preferred_element_type=jnp.float32) + b3_ref[...]
    a = jnp.maximum(a, 0.0)
    a = jnp.dot(a.astype(jnp.bfloat16), w4_ref[...],
                preferred_element_type=jnp.float32) + b4_ref[...]
    o_ref[...] = jnp.tanh(a).astype(o_ref.dtype)


def _pad_params(params):
    """Zero-pad weights/biases to lane-dense widths; weights bf16, biases f32.

    w1 keeps its natural contraction dim K=35 (the unpadded x feeds it
    directly).  Padded rows/columns and padded bias lanes are exactly zero, so
    ReLU/tanh keep the padded activation lanes at zero throughout the net.
    """
    dims = [(INPUT_DIM, H1), (H1, H2), (H2, H3), (H3, OUTPUT_DIM)]
    padded = []
    for i, (fi, fo) in enumerate(dims, start=1):
        k = INPUT_DIM if i == 1 else FEAT
        w = jnp.zeros((k, FEAT), jnp.bfloat16).at[:fi, :fo].set(
            params[f"w{i}"].astype(jnp.bfloat16))
        b = jnp.zeros((1, FEAT), jnp.float32).at[:, :fo].set(
            params[f"b{i}"].astype(jnp.float32))
        padded += [w, b]
    return padded


@functools.partial(jax.jit, static_argnames=("tb",))
def embedding_forward(x, params, tb=DEFAULT_TB):
    """x: (B, 35) float32.  params: dict of w1..w4 (in,out) and b1..b4 (1,out)."""
    B = x.shape[0]
    # Cap the tile so the grid has >= 2 steps when B is large enough (v7x
    # megacore occupancy); keep tiles a multiple of 16 sublanes (bf16 tiling).
    tb_cap = _round_up(-(-B // 2), 16)
    tb = max(16, min(tb, tb_cap))
    grid = (pl.cdiv(B, tb),)   # partial last block handled by Pallas

    w_and_b = _pad_params(params)

    # x streams through in (tb, 35) tiles; the 8 weight/bias operands use a
    # constant index_map and stay VMEM-resident across grid steps.
    in_specs = [pl.BlockSpec((tb, INPUT_DIM), lambda i: (i, 0))]
    for w, b in zip(w_and_b[0::2], w_and_b[1::2]):
        in_specs += [pl.BlockSpec(w.shape, lambda i: (0, 0)),
                     pl.BlockSpec(b.shape, lambda i: (0, 0))]

    out_p = pl.pallas_call(
        _mlp_kernel,
        out_shape=jax.ShapeDtypeStruct((B, FEAT), jnp.bfloat16),
        grid=grid,
        in_specs=in_specs,
        out_specs=pl.BlockSpec((tb, FEAT), lambda i: (i, 0)),
        compiler_params=pltpu.CompilerParams(
            dimension_semantics=("parallel",),
            vmem_limit_bytes=VMEM_LIMIT),
    )(x, *w_and_b)

    # Drop padded output columns; present f32 to the caller (PyTorch parity).
    return out_p[:B, :OUTPUT_DIM].astype(jnp.float32)


def init_params(key):
    """Deterministic init mirroring PyTorch nn.Linear defaults:
    U(-1/sqrt(fan_in), 1/sqrt(fan_in)) for both weight and bias.
    Weights stored as (in, out) so the forward computes x @ W + b."""
    dims = [(INPUT_DIM, H1), (H1, H2), (H2, H3), (H3, OUTPUT_DIM)]
    params = {}
    for i, (fan_in, fan_out) in enumerate(dims, start=1):
        key, kw, kb = jax.random.split(key, 3)
        bound = 1.0 / jnp.sqrt(jnp.float32(fan_in))
        params[f"w{i}"] = jax.random.uniform(
            kw, (fan_in, fan_out), jnp.float32, -bound, bound)
        params[f"b{i}"] = jax.random.uniform(
            kb, (1, fan_out), jnp.float32, -bound, bound)
    return params


def _reference(x, params):
    """Plain-JAX forward with the same bf16-matmul / f32-epilogue recipe."""
    a = x
    for i in (1, 2, 3):
        a = jnp.dot(a.astype(jnp.bfloat16),
                    params[f"w{i}"].astype(jnp.bfloat16),
                    preferred_element_type=jnp.float32) + params[f"b{i}"]
        a = jnp.maximum(a, 0.0)
    a = jnp.dot(a.astype(jnp.bfloat16),
                params["w4"].astype(jnp.bfloat16),
                preferred_element_type=jnp.float32) + params["b4"]
    return jnp.tanh(a)


if __name__ == "__main__":
    key = jax.random.PRNGKey(0)
    key, kx = jax.random.split(key)

    batch = 8
    x = jax.random.normal(kx, (batch, INPUT_DIM), jnp.float32)
    params = init_params(key)

    out = embedding_forward(x, params)
    out = jax.block_until_ready(out)

    ref = _reference(x, params)
    assert out.shape == (batch, OUTPUT_DIM)
    assert jnp.all(jnp.isfinite(out))
    assert jnp.allclose(out, ref, atol=1e-2, rtol=1e-2), (
        float(jnp.max(jnp.abs(out - ref))))

    print("KERNEL_OK")
</pallas_src>

<mosaic_0001>
module attributes {stable_mosaic.version = 11 : i64} {
  func.func @_mlp_kernel(%arg0: i32, %arg1: memref<16x35xf32, #tpu.memory_space<vmem>>, %arg2: memref<35x128xbf16, #tpu.memory_space<vmem>>, %arg3: memref<1x128xf32, #tpu.memory_space<vmem>>, %arg4: memref<128x128xbf16, #tpu.memory_space<vmem>>, %arg5: memref<1x128xf32, #tpu.memory_space<vmem>>, %arg6: memref<128x128xbf16, #tpu.memory_space<vmem>>, %arg7: memref<1x128xf32, #tpu.memory_space<vmem>>, %arg8: memref<128x128xbf16, #tpu.memory_space<vmem>>, %arg9: memref<1x128xf32, #tpu.memory_space<vmem>>, %arg10: memref<16x128xbf16, #tpu.memory_space<vmem>>) attributes {dimension_semantics = [#tpu.dimension_semantics<parallel>], iteration_bounds = array<i64: 1>, scalar_prefetch = 0 : i64, scratch_operands = 0 : i64, tpu.core_type = #tpu.core_type<tc>, window_params = [{transform_indices = @transform_0, window_bounds = array<i64: 16, 35>}, {pipeline_mode = #tpu.pipeline_mode<synchronous>, transform_indices = @transform_1, window_bounds = array<i64: 35, 128>}, {pipeline_mode = #tpu.pipeline_mode<synchronous>, transform_indices = @transform_2, window_bounds = array<i64: 1, 128>}, {pipeline_mode = #tpu.pipeline_mode<synchronous>, transform_indices = @transform_3, window_bounds = array<i64: 128, 128>}, {pipeline_mode = #tpu.pipeline_mode<synchronous>, transform_indices = @transform_4, window_bounds = array<i64: 1, 128>}, {pipeline_mode = #tpu.pipeline_mode<synchronous>, transform_indices = @transform_5, window_bounds = array<i64: 128, 128>}, {pipeline_mode = #tpu.pipeline_mode<synchronous>, transform_indices = @transform_6, window_bounds = array<i64: 1, 128>}, {pipeline_mode = #tpu.pipeline_mode<synchronous>, transform_indices = @transform_7, window_bounds = array<i64: 128, 128>}, {pipeline_mode = #tpu.pipeline_mode<synchronous>, transform_indices = @transform_8, window_bounds = array<i64: 1, 128>}, {transform_indices = @transform_9, window_bounds = array<i64: 16, 128>}]} {
    %c0 = arith.constant 0 : index
    %c0_0 = arith.constant 0 : index
    %0 = vector.load %arg1[%c0, %c0_0] : memref<16x35xf32, #tpu.memory_space<vmem>>, vector<16x35xf32>
    %1 = arith.truncf %0 : vector<16x35xf32> to vector<16x35xbf16>
    %c0_1 = arith.constant 0 : index
    %c0_2 = arith.constant 0 : index
    %2 = vector.load %arg2[%c0_1, %c0_2] : memref<35x128xbf16, #tpu.memory_space<vmem>>, vector<35x128xbf16>
    %cst = arith.constant dense<0.000000e+00> : vector<16x128xf32>
    %3 = tpu.matmul %1, %2, %cst {dimension_numbers = #tpu.dot_dimension_numbers<[1], [0], [0], [1], [0, 0, 1, 1], [], []>} : vector<16x35xbf16>, vector<35x128xbf16>, vector<16x128xf32> -> vector<16x128xf32>
    %c0_3 = arith.constant 0 : index
    %c0_4 = arith.constant 0 : index
    %4 = vector.load %arg3[%c0_3, %c0_4] : memref<1x128xf32, #tpu.memory_space<vmem>>, vector<1x128xf32>
    %5 = vector.broadcast %4 : vector<1x128xf32> to vector<16x128xf32>
    %6 = arith.addf %3, %5 : vector<16x128xf32>
    %cst_5 = arith.constant 0.000000e+00 : f32
    %7 = vector.broadcast %cst_5 : f32 to vector<16x128xf32>
    %8 = arith.maximumf %6, %7 : vector<16x128xf32>
    %9 = arith.truncf %8 : vector<16x128xf32> to vector<16x128xbf16>
    %c0_6 = arith.constant 0 : index
    %c0_7 = arith.constant 0 : index
    %10 = vector.load %arg4[%c0_6, %c0_7] : memref<128x128xbf16, #tpu.memory_space<vmem>>, vector<128x128xbf16>
    %cst_8 = arith.constant dense<0.000000e+00> : vector<16x128xf32>
    %11 = tpu.matmul %9, %10, %cst_8 {dimension_numbers = #tpu.dot_dimension_numbers<[1], [0], [0], [1], [0, 0, 1, 1], [], []>} : vector<16x128xbf16>, vector<128x128xbf16>, vector<16x128xf32> -> vector<16x128xf32>
    %c0_9 = arith.constant 0 : index
    %c0_10 = arith.constant 0 : index
    %12 = vector.load %arg5[%c0_9, %c0_10] : memref<1x128xf32, #tpu.memory_space<vmem>>, vector<1x128xf32>
    %13 = vector.broadcast %12 : vector<1x128xf32> to vector<16x128xf32>
    %14 = arith.addf %11, %13 : vector<16x128xf32>
    %cst_11 = arith.constant 0.000000e+00 : f32
    %15 = vector.broadcast %cst_11 : f32 to vector<16x128xf32>
    %16 = arith.maximumf %14, %15 : vector<16x128xf32>
    %17 = arith.truncf %16 : vector<16x128xf32> to vector<16x128xbf16>
    %c0_12 = arith.constant 0 : index
    %c0_13 = arith.constant 0 : index
    %18 = vector.load %arg6[%c0_12, %c0_13] : memref<128x128xbf16, #tpu.memory_space<vmem>>, vector<128x128xbf16>
    %cst_14 = arith.constant dense<0.000000e+00> : vector<16x128xf32>
    %19 = tpu.matmul %17, %18, %cst_14 {dimension_numbers = #tpu.dot_dimension_numbers<[1], [0], [0], [1], [0, 0, 1, 1], [], []>} : vector<16x128xbf16>, vector<128x128xbf16>, vector<16x128xf32> -> vector<16x128xf32>
    %c0_15 = arith.constant 0 : index
    %c0_16 = arith.constant 0 : index
    %20 = vector.load %arg7[%c0_15, %c0_16] : memref<1x128xf32, #tpu.memory_space<vmem>>, vector<1x128xf32>
    %21 = vector.broadcast %20 : vector<1x128xf32> to vector<16x128xf32>
    %22 = arith.addf %19, %21 : vector<16x128xf32>
    %cst_17 = arith.constant 0.000000e+00 : f32
    %23 = vector.broadcast %cst_17 : f32 to vector<16x128xf32>
    %24 = arith.maximumf %22, %23 : vector<16x128xf32>
    %25 = arith.truncf %24 : vector<16x128xf32> to vector<16x128xbf16>
    %c0_18 = arith.constant 0 : index
    %c0_19 = arith.constant 0 : index
    %26 = vector.load %arg8[%c0_18, %c0_19] : memref<128x128xbf16, #tpu.memory_space<vmem>>, vector<128x128xbf16>
    %cst_20 = arith.constant dense<0.000000e+00> : vector<16x128xf32>
    %27 = tpu.matmul %25, %26, %cst_20 {dimension_numbers = #tpu.dot_dimension_numbers<[1], [0], [0], [1], [0, 0, 1, 1], [], []>} : vector<16x128xbf16>, vector<128x128xbf16>, vector<16x128xf32> -> vector<16x128xf32>
    %c0_21 = arith.constant 0 : index
    %c0_22 = arith.constant 0 : index
    %28 = vector.load %arg9[%c0_21, %c0_22] : memref<1x128xf32, #tpu.memory_space<vmem>>, vector<1x128xf32>
    %29 = vector.broadcast %28 : vector<1x128xf32> to vector<16x128xf32>
    %30 = arith.addf %27, %29 : vector<16x128xf32>
    %31 = math.tanh %30 : vector<16x128xf32>
    %32 = arith.truncf %31 : vector<16x128xf32> to vector<16x128xbf16>
    %c0_23 = arith.constant 0 : index
    %c0_24 = arith.constant 0 : index
    %33 = vector.load %arg10[%c0_23, %c0_24] : memref<16x128xbf16, #tpu.memory_space<vmem>>, vector<16x128xbf16>
    tpu.vector_store %arg10[%c0_23, %c0_24], %32 {strides = array<i32>} : memref<16x128xbf16, #tpu.memory_space<vmem>>, vector<16x128xbf16>,
    return
  }
  func.func @transform_0(%arg0: i32) -> (i32, i32) {
    %c0_i32 = arith.constant 0 : i32
    %c0_i32_0 = arith.constant 0 : i32
    return %arg0, %c0_i32 : i32, i32
  }
  func.func @transform_1(%arg0: i32) -> (i32, i32) {
    %c0_i32 = arith.constant 0 : i32
    %c0_i32_0 = arith.constant 0 : i32
    %c0_i32_1 = arith.constant 0 : i32
    return %c0_i32, %c0_i32_0 : i32, i32
  }
  func.func @transform_2(%arg0: i32) -> (i32, i32) {
    %c0_i32 = arith.constant 0 : i32
    %c0_i32_0 = arith.constant 0 : i32
    %c0_i32_1 = arith.constant 0 : i32
    return %c0_i32, %c0_i32_0 : i32, i32
  }
  func.func @transform_3(%arg0: i32) -> (i32, i32) {
    %c0_i32 = arith.constant 0 : i32
    %c0_i32_0 = arith.constant 0 : i32
    %c0_i32_1 = arith.constant 0 : i32
    return %c0_i32, %c0_i32_0 : i32, i32
  }
  func.func @transform_4(%arg0: i32) -> (i32, i32) {
    %c0_i32 = arith.constant 0 : i32
    %c0_i32_0 = arith.constant 0 : i32
    %c0_i32_1 = arith.constant 0 : i32
    return %c0_i32, %c0_i32_0 : i32, i32
  }
  func.func @transform_5(%arg0: i32) -> (i32, i32) {
    %c0_i32 = arith.constant 0 : i32
    %c0_i32_0 = arith.constant 0 : i32
    %c0_i32_1 = arith.constant 0 : i32
    return %c0_i32, %c0_i32_0 : i32, i32
  }
  func.func @transform_6(%arg0: i32) -> (i32, i32) {
    %c0_i32 = arith.constant 0 : i32
    %c0_i32_0 = arith.constant 0 : i32
    %c0_i32_1 = arith.constant 0 : i32
    return %c0_i32, %c0_i32_0 : i32, i32
  }
  func.func @transform_7(%arg0: i32) -> (i32, i32) {
    %c0_i32 = arith.constant 0 : i32
    %c0_i32_0 = arith.constant 0 : i32
    %c0_i32_1 = arith.constant 0 : i32
    return %c0_i32, %c0_i32_0 : i32, i32
  }
  func.func @transform_8(%arg0: i32) -> (i32, i32) {
    %c0_i32 = arith.constant 0 : i32
    %c0_i32_0 = arith.constant 0 : i32
    %c0_i32_1 = arith.constant 0 : i32
    return %c0_i32, %c0_i32_0 : i32, i32
  }
  func.func @transform_9(%arg0: i32) -> (i32, i32) {
    %c0_i32 = arith.constant 0 : i32
    %c0_i32_0 = arith.constant 0 : i32
    return %arg0, %c0_i32 : i32, i32
  }
}

</mosaic_0001>

<bundles_post_ra>
// kernel: embedding_forward.1
= control target key start
LH: loop header
LB: loop body
LE: loop exit
PB: predicated region body
PF: predicated region fallthrough
CT: control target
= control target key end

     0   :  { %vm64_vm0 = vcmask 1040384   ;;  %vm65_vm1 = vcmask 1041408   ;;  %v532_v2 = vmov 65535   ;;  %vm60_vm2 = vcmask 285696   ;;  %s685_s0 = inlined_call_operand.vmem [shape: f32[8,35], index: 0, kind: input, shape index: {}]   ;;  %s686_s1 = inlined_call_operand.vmem [shape: bf16[35,128], index: 1, kind: input, shape index: {}]   ;;  %s687_s2 = inlined_call_operand.vmem [shape: f32[1,128], index: 2, kind: input, shape index: {}]   ;;  %s688_s3 = inlined_call_operand.vmem [shape: bf16[128,128], index: 3, kind: input, shape index: {}]   ;;  %s689_s4 = inlined_call_operand.vmem [shape: f32[1,128], index: 4, kind: input, shape index: {}]   ;;  %s690_s5 = inlined_call_operand.vmem [shape: bf16[128,128], index: 5, kind: input, shape index: {}]   ;;  %s691_s6 = inlined_call_operand.vmem [shape: f32[1,128], index: 6, kind: input, shape index: {}]   ;;  %s692_s7 = inlined_call_operand.vmem [shape: bf16[128,128], index: 7, kind: input, shape index: {}]   ;;  %s693_s8 = inlined_call_operand.vmem [shape: f32[1,128], index: 8, kind: input, shape index: {}]   ;;  %s694_s9 = inlined_call_operand.vmem [shape: bf16[8,128], index: 9, kind: output, shape index: {}]  }
   0x1   :  { %v40_v0 = vld [vmem:[%s686_s1 + $0x10] sm:$0x3]  ;;  %v66_v3 = vsel %vm64_vm0, 4294967295, %v532_v2  ;;  %v501_v5 = vld [vmem:[%s688_s3 + $0x38] sm:$0xff]  ;;  %v493_v9 = vld [vmem:[%s686_s1 + $0x8] sm:$0xff] }
   0x2   :  { %v54_v1 = vunpack.c.l.b16 %v40_v0  ;;  %v67_v4 = vsel %vm65_vm1, %v66_v3, 0  ;;  %v500_v7 = vld [vmem:[%s688_s3 + $0x30] sm:$0xff]  ;;  %156 = vmatpush.bf16.msra.mxu1 %v501_v5  ;;  %v499_v10 = vld [vmem:[%s688_s3 + $0x28] sm:$0xff]  ;;  %v492_v11 = vld [vmem:[%s686_s1] sm:$0xff] }
   0x3   :  { %v33_v12 = vld [vmem:[%s685_s0] sm:$0xff]  ;;  %v34_v13 = vld [vmem:[%s685_s0 + $0x8] sm:$0xff]  ;;  %v497_v16 = vld [vmem:[%s688_s3 + $0x18] sm:$0xff] }
   0x4   :  { %v57_v6 = vpack.c.b16 %v54_v1, %v54_v1  ;;  %v498_v14 = vld [vmem:[%s688_s3 + $0x20] sm:$0xff]  ;;  %v35_v15 = vpack.c.bf16 %v34_v13, %v33_v12  ;;  %v496_v17 = vld [vmem:[%s688_s3 + $0x10] sm:$0xff]  ;;  %v495_v18 = vld [vmem:[%s688_s3 + $0x8] sm:$0xff] }
   0x5   :  { %v494_v19 = vld [vmem:[%s688_s3] sm:$0xff]  ;;  %v509_v20 = vld [vmem:[%s690_s5 + $0x38] sm:$0xff]  ;;  %v508_v21 = vld [vmem:[%s690_s5 + $0x30] sm:$0xff] }
   0x6   :  { %v69_v8 = vand.u32 %v67_v4, %v57_v6  ;;  %157 = vmatpush.bf16.msra.mxu1 %v500_v7  ;;  %241 = vmatpush.bf16.msra.mxu2 %v509_v20  ;;  %v507_v22 = vld [vmem:[%s690_s5 + $0x28] sm:$0xff]  ;;  %v506_v23 = vld [vmem:[%s690_s5 + $0x20] sm:$0xff]  ;;  %v505_v32 = vld [vmem:[%s690_s5 + $0x18] sm:$0xff] }
   0x7   :  { %v524_v25 = vld [vmem:[%s687_s2] ss:$0 sm:$0xff]  ;;  %v504_v33 = vld [vmem:[%s690_s5 + $0x10] sm:$0xff]  ;;  %v503_v34 = vld [vmem:[%s690_s5 + $0x8] sm:$0xff] }
   0x8   :  { %76 = vmatpush.bf16.msra.mxu0 %v69_v8  ;;  %v502_v35 = vld [vmem:[%s690_s5] sm:$0xff]  ;;  %v517_v36 = vld [vmem:[%s692_s7 + $0x38] sm:$0xff]  ;;  %v516_v37 = vld [vmem:[%s692_s7 + $0x30] sm:$0xff] }
   0x9   :  { %326 = vmatpush.bf16.msra.mxu3 %v517_v36  ;;  %v515_v38 = vld [vmem:[%s692_s7 + $0x28] sm:$0xff]  ;;  %v514_v39 = vld [vmem:[%s692_s7 + $0x20] sm:$0xff]  ;;  %v513_v48 = vld [vmem:[%s692_s7 + $0x18] sm:$0xff] }
   0xa   :  { %158 = vmatpush.bf16.msra.mxu1 %v499_v10  ;;  %242 = vmatpush.bf16.msra.mxu2 %v508_v21  ;;  %v525_v41 = vld [vmem:[%s689_s4] ss:$0 sm:$0xff]  ;;  %v512_v49 = vld [vmem:[%s692_s7 + $0x10] sm:$0xff]  ;;  %v511_v50 = vld [vmem:[%s692_s7 + $0x8] sm:$0xff] }
   0xb   :  { %v510_v51 = vld [vmem:[%s692_s7] sm:$0xff] }
   0xc   :  { %77 = vmatpush.bf16.msra.mxu0 %v493_v9  ;;  %v526_v53 = vld [vmem:[%s691_s6] ss:$0 sm:$0xff] }
   0xd   :  { %327 = vmatpush.bf16.msra.mxu3 %v516_v37  ;;  %v527_v61 = vld [vmem:[%s693_s8] ss:$0 sm:$0xff] }
   0xe   :  { %159 = vmatpush.bf16.msra.mxu1 %v498_v14  ;;  %243 = vmatpush.bf16.msra.mxu2 %v507_v22 }
  0x10   :  { %78 = vmatpush.bf16.msra.mxu0 %v492_v11 }
  0x11   :  { %328 = vmatpush.bf16.msra.mxu3 %v515_v38 }
  0x12   :  { %160 = vmatpush.bf16.msra.mxu1 %v497_v16  ;;  %244 = vmatpush.bf16.msra.mxu2 %v506_v23 }
  0x13   :  { %395 = vmatmul.msk.bf16.vlgmr.msra.gmra.mxu0 %vm60_vm2, %v35_v15 }
  0x15   :  { %329 = vmatpush.bf16.msra.mxu3 %v514_v39 }
  0x16   :  { %161 = vmatpush.bf16.msra.mxu1 %v496_v17  ;;  %245 = vmatpush.bf16.msra.mxu2 %v505_v32 }
  0x19   :  { %330 = vmatpush.bf16.msra.mxu3 %v513_v48 }
  0x1a   :  { %162 = vmatpush.bf16.msra.mxu1 %v495_v18  ;;  %246 = vmatpush.bf16.msra.mxu2 %v504_v33 }
  0x1d   :  { %331 = vmatpush.bf16.msra.mxu3 %v512_v49 }
  0x1e   :  { %163 = vmatpush.bf16.msra.mxu1 %v494_v19  ;;  %247 = vmatpush.bf16.msra.mxu2 %v503_v34 }
  0x21   :  { %332 = vmatpush.bf16.msra.mxu3 %v511_v50 }
  0x22   :  { %248 = vmatpush.bf16.msra.mxu2 %v502_v35 }
  0x25   :  { %333 = vmatpush.bf16.msra.mxu3 %v510_v51 }
  0x90   :  { %v80_v24 = vpop.f32.mrf.mxu0 }
  0x91   :  { %v81_v26 = vadd.f32 %v524_v25, %v80_v24 }
  0x93   :  { %v85_v29 = vmax.f32 %v81_v26, 0.0 }
  0x98   :  { %v82_v27 = vpop.f32.mrf.mxu0 }
  0x99   :  { %v83_v28 = vadd.f32 %v524_v25, %v82_v27 }
  0x9b   :  { %v86_v30 = vmax.f32 %v83_v28, 0.0 }
  0x9d   :  { %v87_v31 = vpack.c.bf16 %v86_v30, %v85_v29 }
  0x9f   :  { %164 = vmatmul.bf16.vlgmr.msra.gmra.mxu1 %v87_v31 }
 0x11c   :  { %v165_v40 = vpop.f32.mrf.mxu1 }
 0x11d   :  { %v166_v42 = vadd.f32 %v525_v41, %v165_v40 }
 0x11f   :  { %v170_v45 = vmax.f32 %v166_v42, 0.0 }
 0x124   :  { %v167_v43 = vpop.f32.mrf.mxu1 }
 0x125   :  { %v168_v44 = vadd.f32 %v525_v41, %v167_v43 }
 0x127   :  { %v171_v46 = vmax.f32 %v168_v44, 0.0 }
 0x129   :  { %v172_v47 = vpack.c.bf16 %v171_v46, %v170_v45 }
 0x12b   :  { %249 = vmatmul.bf16.vlgmr.msra.gmra.mxu2 %v172_v47 }
 0x1ae   :  { %v250_v52 = vpop.f32.mrf.mxu2 }
 0x1af   :  { %v251_v54 = vadd.f32 %v526_v53, %v250_v52 }
 0x1b1   :  { %v255_v57 = vmax.f32 %v251_v54, 0.0 }
 0x1b6   :  { %v252_v55 = vpop.f32.mrf.mxu2 }
 0x1b7   :  { %v253_v56 = vadd.f32 %v526_v53, %v252_v55 }
 0x1b9   :  { %v256_v58 = vmax.f32 %v253_v56, 0.0 }
 0x1bb   :  { %v257_v59 = vpack.c.bf16 %v256_v58, %v255_v57 }
 0x1bd   :  { %334 = vmatmul.bf16.vlgmr.msra.gmra.mxu3 %v257_v59 }
 0x240   :  { %v335_v60 = vpop.f32.mrf.mxu3 }
 0x241   :  { %v336_v62 = vadd.f32 %v527_v61, %v335_v60 }
 0x243   :  { %528 = vtanh.f32 %v336_v62 }
 0x248   :  { %v337_v63 = vpop.f32.mrf.mxu3 }
 0x249   :  { %v338_v0 = vadd.f32 %v527_v61, %v337_v63  ;;  %v529_v1 = vpop.eup %528 }
 0x24b   :  { %530 = vtanh.f32 %v338_v0 }
 0x251   :  { %v531_v2 = vpop.eup %530 }
 0x252   :  { %v521_v3 = vpack.c.bf16 %v531_v2, %v529_v1 }
 0x254   :  { %522 = vst [vmem:[#allocation2] sm:$0xff] %v521_v3  }
 0x25b   :  { %v364_v4 = vld [vmem:[#allocation2] sm:$0xf] }
 0x25c   :  { %365 = vst [vmem:[%s694_s9] sm:$0xf] %v364_v4 }

</bundles_post_ra>
